<compile_context>
chip_gen: v7x
topology: tpu7x:2x2x1
jax: 0.10.0
libtpu: 0.0.40
codegen_flags: <defaults>
</compile_context>

<pallas_src>
import functools

import jax
import jax.numpy as jnp
from jax.experimental import pallas as pl
from jax.experimental.pallas import tpu as pltpu


_NEG_LARGE = -1e30   # finite stand-in for -inf (diagonal is never masked)


def _default_exp_dtype():
    # bf16 exp only on generations whose EUP has a bf16 path (v6e / v7x).
    try:
        kind = jax.devices()[0].device_kind.lower()
    except Exception:
        return jnp.float32
    if "v6" in kind or "v7" in kind:
        return jnp.bfloat16
    return jnp.float32


def _head_kernel(x_ref, wqkv_ref, bias_ref, o_ref, *, bb, T, nh, H,
                 mxu_dtype, exp_dtype):
    # x_ref: (bb, T, C) f32 block; wqkv_ref: (C, 3*nh*H) bf16 resident;
    # bias_ref: (T, T) f32 resident causal bias; o_ref: (bb, T, nh*H) f32.
    C = x_ref.shape[-1]

    # Cast to bf16 in-kernel (VPU work hidden under the MXU) — avoids an extra
    # wrapper-side HBM pass over x.
    xf = x_ref[...].reshape(bb * T, C).astype(mxu_dtype)          # (M, C)

    # Fused K/Q/V projection for all heads: one MXU matmul, f32 accumulation.
    # Column layout is [K | Q | V]; Q columns carry the C**-0.5 scale already.
    qkv = jnp.dot(xf, wqkv_ref[...],
                  preferred_element_type=jnp.float32)             # (M, 3*nh*H)

    bias = bias_ref[...]                                          # (T, T) f32

    outs = []
    for h in range(nh):                                           # static unroll
        k = qkv[:, (0 * nh + h) * H:(0 * nh + h + 1) * H].reshape(bb, T, H).astype(mxu_dtype)
        q = qkv[:, (1 * nh + h) * H:(1 * nh + h + 1) * H].reshape(bb, T, H).astype(mxu_dtype)
        v = qkv[:, (2 * nh + h) * H:(2 * nh + h + 1) * H].reshape(bb, T, H).astype(mxu_dtype)

        # Scores: contract head dim of q and k directly (no k.T materialization).
        s = jnp.einsum('bqd,bkd->bqk', q, k,
                       preferred_element_type=jnp.float32)        # (bb, T, T) f32
        s = s + bias[None, :, :]                                  # additive causal mask

        # Numerically-stable softmax; row max / sum / reciprocal stay f32,
        # exp runs in bf16 on v6e/v7x (exp_dtype), f32 on v5e.
        m = jnp.max(s, axis=-1, keepdims=True)
        p = jnp.exp((s - m).astype(exp_dtype))
        l = jnp.sum(p, axis=-1, keepdims=True, dtype=jnp.float32)
        inv = pl.reciprocal(l, approx=True)                       # EUP vrcp

        # Dropout (p=0.2) on attention weights: eval mode -> identity.

        # Fold the softmax normalization into the 4x-smaller output tile.
        o = jnp.einsum('bqk,bkd->bqd', p.astype(mxu_dtype), v,
                       preferred_element_type=jnp.float32)        # (bb, T, H) f32
        outs.append(o * inv)

    out = outs[0] if nh == 1 else jnp.concatenate(outs, axis=-1)  # (bb, T, nh*H)
    o_ref[...] = out.astype(o_ref.dtype)


def fused_heads_forward(x, wqs, wks, wvs, *, batch_block=None,
                        mxu_dtype=jnp.bfloat16, exp_dtype=None):
    """Fused multi-head attention forward (eval mode).

    x: (B, T, C) f32; wqs/wks/wvs: per-head (C, H) f32 weights (lists or single
    arrays).  Returns the concatenation of each Head's output along the last
    dim: (B, T, n_head * H) f32.
    """
    if not isinstance(wqs, (list, tuple)):
        wqs, wks, wvs = [wqs], [wks], [wvs]
    B, T, C = x.shape
    nh = len(wqs)
    H = wqs[0].shape[1]
    scale = float(C) ** -0.5          # matches the module: C**-0.5, not head_size**-0.5

    if exp_dtype is None:
        exp_dtype = _default_exp_dtype()

    if batch_block is None:
        # Fill the MXU M dimension (~512 rows per step) but keep the "parallel"
        # grid axis at extent >= 2 so v7x's two TensorCores both get work and
        # the pipeline can double-buffer.
        batch_block = max(1, min(B, max(1, 512 // T)))
        if B >= 2:
            batch_block = min(batch_block, B // 2)
    batch_block = max(1, batch_block)
    while B % batch_block:            # keep it a divisor of B
        batch_block -= 1
    bb = batch_block

    # One lane-dense resident weight slab, columns ordered [K | Q | V] so the
    # operand feeding the transposed side of the score matmul starts at lane 0.
    # The attention scale is folded into the Q columns in f32 before casting.
    wqkv = jnp.concatenate(list(wks) + [w * scale for w in wqs] + list(wvs),
                           axis=1).astype(mxu_dtype)              # (C, 3*nh*H)

    # Resident additive causal-mask bias: 0 on/below diagonal, -1e30 above.
    bias = jnp.where(jnp.tril(jnp.ones((T, T), dtype=bool)),
                     jnp.float32(0.0), jnp.float32(_NEG_LARGE))

    kernel = functools.partial(_head_kernel, bb=bb, T=T, nh=nh, H=H,
                               mxu_dtype=mxu_dtype, exp_dtype=exp_dtype)

    cost = pl.CostEstimate(
        flops=int(2 * B * T * C * 3 * nh * H + 4 * B * nh * T * T * H),
        transcendentals=int(B * nh * T * T),
        bytes_accessed=int(B * T * C * 4 + C * 3 * nh * H * 2
                           + T * T * 4 + B * T * nh * H * 4),
    )

    return pl.pallas_call(
        kernel,
        out_shape=jax.ShapeDtypeStruct((B, T, nh * H), x.dtype),
        grid_spec=pltpu.PrefetchScalarGridSpec(
            num_scalar_prefetch=0,
            grid=(B // bb,),
            in_specs=[
                pl.BlockSpec((bb, T, C), lambda b: (b, 0, 0)),      # x (f32) batch chunk
                pl.BlockSpec((C, 3 * nh * H), lambda b: (0, 0)),    # fused Wkqv (resident)
                pl.BlockSpec((T, T), lambda b: (0, 0)),             # causal bias (resident)
            ],
            out_specs=pl.BlockSpec((bb, T, nh * H), lambda b: (b, 0, 0)),
        ),
        compiler_params=pltpu.CompilerParams(
            dimension_semantics=("parallel",),
        ),
        cost_estimate=cost,
    )(x, wqkv, bias)


def head_forward(x, wq, wk, wv, **kwargs):
    """Exact forward of the PyTorch `Head` module (eval mode): (B,T,C) -> (B,T,H)."""
    return fused_heads_forward(x, [wq], [wk], [wv], **kwargs)


def _reference(x, wq, wk, wv):
    B, T, C = x.shape
    q = x @ wq
    k = x @ wk
    v = x @ wv
    wei = (q @ jnp.swapaxes(k, -2, -1)) * (float(C) ** -0.5)
    mask = jnp.tril(jnp.ones((T, T), dtype=bool))
    wei = jnp.where(mask[None, :, :], wei, -jnp.inf)
    wei = jax.nn.softmax(wei, axis=-1)
    return wei @ v


if __name__ == "__main__":
    # Small shapes consistent with the module: n_embed = 6*64 = 384,
    # head_size = n_embed // 6 = 64, short sequence T=8, batch B=2.
    B, T = 2, 8
    n_embed = 6 * 64
    head_size = n_embed // 6

    key = jax.random.PRNGKey(0)
    kx, kq, kk, kv = jax.random.split(key, 4)

    x = jax.random.normal(kx, (B, T, n_embed), dtype=jnp.float32)

    # Deterministic nn.Linear-style init: U(-1/sqrt(fan_in), 1/sqrt(fan_in)).
    bound = 1.0 / (n_embed ** 0.5)
    wq = jax.random.uniform(kq, (n_embed, head_size), jnp.float32, -bound, bound)
    wk = jax.random.uniform(kk, (n_embed, head_size), jnp.float32, -bound, bound)
    wv = jax.random.uniform(kv, (n_embed, head_size), jnp.float32, -bound, bound)

    # --- Single Head (the module's exact semantics) ---
    out = jax.block_until_ready(head_forward(x, wq, wk, wv))
    ref = _reference(x, wq, wk, wv)
    assert out.shape == (B, T, head_size), out.shape
    max_err = float(jnp.max(jnp.abs(out - ref)))
    # bf16 MXU operands + approx reciprocal (+ bf16 exp on v6e/v7x): compare
    # against the f32 reference with a bf16-appropriate tolerance.
    assert jnp.allclose(out, ref, atol=3e-2, rtol=3e-2), (
        f"single-head mismatch vs reference, max abs err={max_err}")

    # --- Fused multi-head path (review's top perf lever, lane-dense output) ---
    n_head = 6
    kws = jax.random.split(jax.random.PRNGKey(1), 3 * n_head)
    wqs = [jax.random.uniform(kws[i], (n_embed, head_size), jnp.float32, -bound, bound)
           for i in range(n_head)]
    wks = [jax.random.uniform(kws[n_head + i], (n_embed, head_size), jnp.float32, -bound, bound)
           for i in range(n_head)]
    wvs = [jax.random.uniform(kws[2 * n_head + i], (n_embed, head_size), jnp.float32, -bound, bound)
           for i in range(n_head)]
    out_mh = jax.block_until_ready(fused_heads_forward(x, wqs, wks, wvs))
    ref_mh = jnp.concatenate([_reference(x, wqs[h], wks[h], wvs[h])
                              for h in range(n_head)], axis=-1)
    assert out_mh.shape == (B, T, n_head * head_size), out_mh.shape
    max_err_mh = float(jnp.max(jnp.abs(out_mh - ref_mh)))
    assert jnp.allclose(out_mh, ref_mh, atol=3e-2, rtol=3e-2), (
        f"fused multi-head mismatch vs reference, max abs err={max_err_mh}")

    print("KERNEL_OK")
</pallas_src>

<mosaic_0001>
module attributes {stable_mosaic.version = 11 : i64} {
  func.func @_head_kernel(%arg0: i32, %arg1: memref<1x8x384xf32, #tpu.memory_space<vmem>>, %arg2: memref<384x192xbf16, #tpu.memory_space<vmem>>, %arg3: memref<8x8xf32, #tpu.memory_space<vmem>>, %arg4: memref<1x8x64xf32, #tpu.memory_space<vmem>>) attributes {dimension_semantics = [#tpu.dimension_semantics<parallel>], iteration_bounds = array<i64: 2>, scalar_prefetch = 0 : i64, scratch_operands = 0 : i64, tpu.core_type = #tpu.core_type<tc>, window_params = [{transform_indices = @transform_0, window_bounds = array<i64: 1, 8, 384>}, {pipeline_mode = #tpu.pipeline_mode<synchronous>, transform_indices = @transform_1, window_bounds = array<i64: 384, 192>}, {pipeline_mode = #tpu.pipeline_mode<synchronous>, transform_indices = @transform_2, window_bounds = array<i64: 8, 8>}, {transform_indices = @transform_3, window_bounds = array<i64: 1, 8, 64>}]} {
    %c0 = arith.constant 0 : index
    %c0_0 = arith.constant 0 : index
    %c0_1 = arith.constant 0 : index
    %0 = vector.load %arg1[%c0, %c0_0, %c0_1] : memref<1x8x384xf32, #tpu.memory_space<vmem>>, vector<1x8x384xf32>
    %1 = vector.shape_cast %0 : vector<1x8x384xf32> to vector<8x384xf32>
    %2 = arith.truncf %1 : vector<8x384xf32> to vector<8x384xbf16>
    %c0_2 = arith.constant 0 : index
    %c0_3 = arith.constant 0 : index
    %3 = vector.load %arg2[%c0_2, %c0_3] : memref<384x192xbf16, #tpu.memory_space<vmem>>, vector<384x192xbf16>
    %cst = arith.constant dense<0.000000e+00> : vector<8x192xf32>
    %4 = tpu.matmul %2, %3, %cst {dimension_numbers = #tpu.dot_dimension_numbers<[1], [0], [0], [1], [0, 0, 1, 1], [], []>} : vector<8x384xbf16>, vector<384x192xbf16>, vector<8x192xf32> -> vector<8x192xf32>
    %c0_4 = arith.constant 0 : index
    %c0_5 = arith.constant 0 : index
    %5 = vector.load %arg3[%c0_4, %c0_5] : memref<8x8xf32, #tpu.memory_space<vmem>>, vector<8x8xf32>
    %6 = vector.extract_strided_slice %4 {offsets = [0, 0], sizes = [8, 64], strides = [1, 1]} : vector<8x192xf32> to vector<8x64xf32>
    %7 = vector.shape_cast %6 : vector<8x64xf32> to vector<1x8x64xf32>
    %8 = arith.truncf %7 : vector<1x8x64xf32> to vector<1x8x64xbf16>
    %9 = vector.extract_strided_slice %4 {offsets = [0, 64], sizes = [8, 64], strides = [1, 1]} : vector<8x192xf32> to vector<8x64xf32>
    %10 = vector.shape_cast %9 : vector<8x64xf32> to vector<1x8x64xf32>
    %11 = arith.truncf %10 : vector<1x8x64xf32> to vector<1x8x64xbf16>
    %12 = vector.extract_strided_slice %4 {offsets = [0, 128], sizes = [8, 64], strides = [1, 1]} : vector<8x192xf32> to vector<8x64xf32>
    %13 = vector.shape_cast %12 : vector<8x64xf32> to vector<1x8x64xf32>
    %14 = arith.truncf %13 : vector<1x8x64xf32> to vector<1x8x64xbf16>
    "tpu.trace_start"() <{level = 10 : i32, message = "bqd,bkd->bqk"}> : () -> ()
    %cst_6 = arith.constant dense<0.000000e+00> : vector<1x8x8xf32>
    %15 = tpu.matmul %11, %8, %cst_6 {dimension_numbers = #tpu.dot_dimension_numbers<[2], [2], [1], [1], [0, 0, 0, 1, 1, 1], [0], [0]>} : vector<1x8x64xbf16>, vector<1x8x64xbf16>, vector<1x8x8xf32> -> vector<1x8x8xf32>
    "tpu.trace_stop"() : () -> ()
    %16 = vector.shape_cast %5 : vector<8x8xf32> to vector<1x8x8xf32>
    %17 = arith.addf %15, %16 : vector<1x8x8xf32>
    %cst_7 = arith.constant dense<0xFF800000> : vector<1x8xf32>
    %18 = vector.multi_reduction <maximumf>, %17, %cst_7 [2] : vector<1x8x8xf32> to vector<1x8xf32>
    %19 = vector.shape_cast %18 : vector<1x8xf32> to vector<1x8x1xf32>
    %20 = vector.broadcast %19 : vector<1x8x1xf32> to vector<1x8x8xf32>
    %21 = arith.subf %17, %20 : vector<1x8x8xf32>
    %22 = math.exp %21 : vector<1x8x8xf32>
    %cst_8 = arith.constant dense<0.000000e+00> : vector<1x8xf32>
    %23 = vector.multi_reduction <add>, %22, %cst_8 [2] : vector<1x8x8xf32> to vector<1x8xf32>
    %24 = vector.shape_cast %23 : vector<1x8xf32> to vector<1x8x1xf32>
    %25 = tpu.reciprocal %24 {approx = true} : vector<1x8x1xf32> -> vector<1x8x1xf32>
    %26 = arith.truncf %22 : vector<1x8x8xf32> to vector<1x8x8xbf16>
    "tpu.trace_start"() <{level = 10 : i32, message = "bqk,bkd->bqd"}> : () -> ()
    %cst_9 = arith.constant dense<0.000000e+00> : vector<1x8x64xf32>
    %27 = tpu.matmul %26, %14, %cst_9 {dimension_numbers = #tpu.dot_dimension_numbers<[2], [1], [1], [2], [0, 0, 0, 1, 1, 2], [0], [0]>} : vector<1x8x8xbf16>, vector<1x8x64xbf16>, vector<1x8x64xf32> -> vector<1x8x64xf32>
    "tpu.trace_stop"() : () -> ()
    %28 = vector.broadcast %25 : vector<1x8x1xf32> to vector<1x8x64xf32>
    %29 = arith.mulf %27, %28 : vector<1x8x64xf32>
    %c0_10 = arith.constant 0 : index
    %c0_11 = arith.constant 0 : index
    %c0_12 = arith.constant 0 : index
    %30 = vector.load %arg4[%c0_10, %c0_11, %c0_12] : memref<1x8x64xf32, #tpu.memory_space<vmem>>, vector<1x8x64xf32>
    tpu.vector_store %arg4[%c0_10, %c0_11, %c0_12], %29 {strides = array<i32>} : memref<1x8x64xf32, #tpu.memory_space<vmem>>, vector<1x8x64xf32>,
    return
  }
  func.func @transform_0(%arg0: i32) -> (i32, i32, i32) {
    %c0_i32 = arith.constant 0 : i32
    %c0_i32_0 = arith.constant 0 : i32
    %c0_i32_1 = arith.constant 0 : i32
    return %arg0, %c0_i32, %c0_i32_0 : i32, i32, i32
  }
  func.func @transform_1(%arg0: i32) -> (i32, i32) {
    %c0_i32 = arith.constant 0 : i32
    %c0_i32_0 = arith.constant 0 : i32
    %c0_i32_1 = arith.constant 0 : i32
    return %c0_i32, %c0_i32_0 : i32, i32
  }
  func.func @transform_2(%arg0: i32) -> (i32, i32) {
    %c0_i32 = arith.constant 0 : i32
    %c0_i32_0 = arith.constant 0 : i32
    %c0_i32_1 = arith.constant 0 : i32
    return %c0_i32, %c0_i32_0 : i32, i32
  }
  func.func @transform_3(%arg0: i32) -> (i32, i32, i32) {
    %c0_i32 = arith.constant 0 : i32
    %c0_i32_0 = arith.constant 0 : i32
    %c0_i32_1 = arith.constant 0 : i32
    return %arg0, %c0_i32, %c0_i32_0 : i32, i32, i32
  }
}

</mosaic_0001>

<bundles_post_ra>
// kernel: tpu_custom_call.1
= control target key start
LH: loop header
LB: loop body
LE: loop exit
PB: predicated region body
PF: predicated region fallthrough
CT: control target
= control target key end

     0   :  { %8 = vsyncpa [#allocation3], 0  ;;  %s1277_s0 = inlined_call_operand.vmem [shape: f32[2,8,384], index: 0, kind: input, shape index: {}]   ;;  %s1278_s1 = inlined_call_operand.vmem [shape: bf16[384,192], index: 1, kind: input, shape index: {}]   ;;  %s1279_s2 = inlined_call_operand.vmem [shape: f32[8,8], index: 2, kind: input, shape index: {}]   ;;  %s1280_s3 = inlined_call_operand.hbm [shape: f32[2,8,64], index: 3, kind: output, shape index: {}]  }
   0x1   :  { %10 = vsyncpa [#allocation3 + $0x1], 0  ;;  %s1020_s12 = smov 0   ;;  %s1022_s13 = smov 0  }
   0x2   :  { %s1024_s14 = smov 0   ;;  %s1026_s15 = smov 0  }
   0x3 LB: > { %s1041_s16 = sadd.s32 4294967295, %s993_s15   ;;  %s733_s17 = sadd.s32 4294967294, %s993_s15   ;;  %s993_s15 = sphi %s1026_s15, %s1286_s15   ;;  %s989_s14 = sphi %s1024_s14, %s1285_s14   ;;  %s985_s13 = sphi %s1022_s13, %s1284_s13   ;;  %s981_s12 = sphi %s1020_s12, %s1283_s12  }
   0x4   : > { %s1045_s18 = sadd.s32 1, %s993_s15   ;;  %s91_s19 = sadd.s32 1, %s989_s14 }
   0x5   : > { %s88_s20 = ssub.s32 %s993_s15, %s1045_s18  ;;  %p101_p0 = scmp.ne.s32.totalorder %s989_s14, %s985_s13 }
   0x6   : > { %p89_p1 = scmp.eq.s32.totalorder %s88_s20, 0  ;;  %p102_p2 = scmp.eq.s32.totalorder %s1041_s16, 1 }
   0x7   : > { %p107_p3 = scmp.ne.s32.totalorder %s985_s13, %s981_s12  ;;  %p108_p4 = scmp.eq.s32.totalorder %s733_s17, 1 }
   0x8   : > { %s1056_s21 = scalar_select %p89_p1, %s989_s14, %s91_s19  }
   0x9   : > { %p1058_p5 = por %p102_p2, %p101_p0  ;;  %p1062_p6 = por %p108_p4, %p107_p3 }
   0xa   : > { %p736_p7 = scmp.ge.s32.totalorder %s993_s15, 1  ;;  %p140_p8 = scmp.lt.s32.totalorder %s993_s15, 3 }
   0xc   : > { %p141_p9 = pnand %p736_p7, %p140_p8 }
   0xd   : > { %v855_v0 = vld [vmem:[%s1278_s1 + $0x4] ss:$8 sps:$4 sm:$0xff] (!%p141_p9)   ;;  %v857_v1 = vld [vmem:[%s1278_s1] ss:$8 sps:$4 sm:$0xff] (!%p141_p9)   ;;  %v995_v2 = vmov (!%p141_p9), 0   ;;  %p164_p10 = scmp.lt.s32.totalorder (!%p141_p9), %s1041_s16, 1 }
   0xe   : > { %144 = sbr.rel (%p141_p9) target bundleno = 1011 (0x3f3), region = 32  ;;  %537 = vmatprep.mubr.bf16.mxu1 (!%p141_p9), %v995_v2  ;;  %464 = vmatprep.subr.bf16.mxu0 (!%p141_p9), %v855_v0  ;;  %v858_v3 = vld [vmem:[%s1278_s1 + $0x14] ss:$8 sps:$4 sm:$0xff] (!%p141_p9)   ;;  %v860_v4 = vld [vmem:[%s1278_s1 + $0x10] ss:$8 sps:$4 sm:$0xff] (!%p141_p9)   ;;  %v996_v55 = vmov (!%p141_p9), 0.0  }
   0xf   : > { %465 = vmatpush1.bf16.msra.mxu0 (!%p141_p9), %v857_v1  ;;  %v861_v5 = vld [vmem:[%s1278_s1 + $0x24] ss:$8 sps:$4 sm:$0xff] (!%p141_p9)   ;;  %v863_v6 = vld [vmem:[%s1278_s1 + $0x20] ss:$8 sps:$4 sm:$0xff] (!%p141_p9)   ;;  %v864_v7 = vld [vmem:[%s1278_s1 + $0x34] ss:$8 sps:$4 sm:$0xff] (!%p141_p9)  }
  0x10   : > { %466 = vmatprep.subr.bf16.mxu0 (!%p141_p9), %v858_v3  ;;  %v866_v8 = vld [vmem:[%s1278_s1 + $0x30] ss:$8 sps:$4 sm:$0xff] (!%p141_p9)   ;;  %v879_v9 = vld [vmem:[%s1278_s1 + $0x104] ss:$8 sps:$4 sm:$0xff] (!%p141_p9)   ;;  %v881_v10 = vld [vmem:[%s1278_s1 + $0x100] ss:$8 sps:$4 sm:$0xff] (!%p141_p9)  }
  0x11   : > { %v867_v11 = vld [vmem:[%s1278_s1 + $0x44] ss:$8 sps:$4 sm:$0xff] (!%p141_p9)   ;;  %505 = vmatprep.subr.bf16.mxu1 (!%p141_p9), %v879_v9  ;;  %v885_v12 = vld [vmem:[%s1278_s1 + $0x114] ss:$8 sps:$4 sm:$0xff] (!%p141_p9)   ;;  %v887_v13 = vld [vmem:[%s1278_s1 + $0x110] ss:$8 sps:$4 sm:$0xff] (!%p141_p9)  }
  0x12   : > { %506 = vmatpush1.bf16.msra.mxu1 (!%p141_p9), %v881_v10  ;;  %v869_v14 = vld [vmem:[%s1278_s1 + $0x40] ss:$8 sps:$4 sm:$0xff] (!%p141_p9)   ;;  %v870_v15 = vld [vmem:[%s1278_s1 + $0x54] ss:$8 sps:$4 sm:$0xff] (!%p141_p9)   ;;  %v891_v16 = vld [vmem:[%s1278_s1 + $0x124] ss:$8 sps:$4 sm:$0xff] (!%p141_p9)  }
  0x13   : > { %467 = vmatpush1.bf16.msra.mxu0 (!%p141_p9), %v860_v4  ;;  %507 = vmatprep.subr.bf16.mxu1 (!%p141_p9), %v885_v12  ;;  %v893_v17 = vld [vmem:[%s1278_s1 + $0x120] ss:$8 sps:$4 sm:$0xff] (!%p141_p9)   ;;  %v872_v18 = vld [vmem:[%s1278_s1 + $0x50] ss:$8 sps:$4 sm:$0xff] (!%p141_p9)   ;;  %v897_v19 = vld [vmem:[%s1278_s1 + $0x134] ss:$8 sps:$4 sm:$0xff] (!%p141_p9)  }
  0x14   : > { %468 = vmatprep.subr.bf16.mxu0 (!%p141_p9), %v861_v5  ;;  %v873_v20 = vld [vmem:[%s1278_s1 + $0x64] ss:$8 sps:$4 sm:$0xff] (!%p141_p9)   ;;  %v899_v21 = vld [vmem:[%s1278_s1 + $0x130] ss:$8 sps:$4 sm:$0xff] (!%p141_p9)   ;;  %v875_v22 = vld [vmem:[%s1278_s1 + $0x60] ss:$8 sps:$4 sm:$0xff] (!%p141_p9)  }
  0x15   : > { %v903_v23 = vld [vmem:[%s1278_s1 + $0x144] ss:$8 sps:$4 sm:$0xff]   ;;  %s165_s7 = scalar_select %p164_p10, %s1041_s16, 1  ;;  %v876_v24 = vld [vmem:[%s1278_s1 + $0x74] ss:$8 sps:$4 sm:$0xff]   ;;  %vm997_vm0 = vmmov 0  }
  0x16   : > { %508 = vmatpush1.bf16.msra.mxu1 %v887_v13  ;;  %v905_v25 = vld [vmem:[%s1278_s1 + $0x140] ss:$8 sps:$4 sm:$0xff]   ;;  %v878_v26 = vld [vmem:[%s1278_s1 + $0x70] ss:$8 sps:$4 sm:$0xff]   ;;  %v909_v27 = vld [vmem:[%s1278_s1 + $0x154] ss:$8 sps:$4 sm:$0xff]  }
  0x17   : > { %469 = vmatpush1.bf16.msra.mxu0 %v863_v6  ;;  %509 = vmatprep.subr.bf16.mxu1 %v891_v16  ;;  %s811_s25 = smul.u32 24, %s165_s7  ;;  %v882_v28 = vld [vmem:[%s1278_s1 + $0x84] ss:$8 sps:$4 sm:$0xff]   ;;  %v911_v29 = vld [vmem:[%s1278_s1 + $0x150] ss:$8 sps:$4 sm:$0xff]   ;;  %vm552_vm1 = vcmask 523264  }
  0x18   : > { %470 = vmatprep.subr.bf16.mxu0 %v864_v7  ;;  %v884_v30 = vld [vmem:[%s1278_s1 + $0x80] ss:$8 sps:$4 sm:$0xff]   ;;  %v915_v31 = vld [vmem:[%s1278_s1 + $0x164] ss:$8 sps:$4 sm:$0xff]   ;;  %v888_v32 = vld [vmem:[%s1278_s1 + $0x94] ss:$8 sps:$4 sm:$0xff]  }
  0x19   : > { %s1166_s9 = scalar_lea.vmem %s1277_s0, %s811_s25  ;;  %v917_v35 = vld [vmem:[%s1278_s1 + $0x160] ss:$8 sps:$4 sm:$0xff]   ;;  %v890_v36 = vld [vmem:[%s1278_s1 + $0x90] ss:$8 sps:$4 sm:$0xff]   ;;  %v921_v37 = vld [vmem:[%s1278_s1 + $0x174] ss:$8 sps:$4 sm:$0xff]  }
  0x1a   : > { %510 = vmatpush1.bf16.msra.mxu1 %v893_v17  ;;  %v171_v33 = vld [vmem:[%s1166_s9 + $0x8] sm:$0xff]  ;;  %v923_v39 = vld [vmem:[%s1278_s1 + $0x170] ss:$8 sps:$4 sm:$0xff]   ;;  %v900_v42 = vld [vmem:[%s1278_s1 + $0xb4] ss:$8 sps:$4 sm:$0xff]   ;;  %vm614_vm2 = vcmask 1043456  }
  0x1b   : > { %471 = vmatpush1.bf16.msra.mxu0 %v866_v8  ;;  %511 = vmatprep.subr.bf16.mxu1 %v897_v19  ;;  %v174_v34 = vpack.c.bf16 %v171_v33, %v171_v33  ;;  %v894_v38 = vld [vmem:[%s1278_s1 + $0xa4] ss:$8 sps:$4 sm:$0xff]   ;;  %v172_v40 = vld [vmem:[%s1166_s9 + $0x10] sm:$0xff]  ;;  %v896_v41 = vld [vmem:[%s1278_s1 + $0xa0] ss:$8 sps:$4 sm:$0xff]   ;;  %vm599_vm3 = vcmask 64512  }
  0x1c   : > { %472 = vmatprep.subr.bf16.mxu0 %v867_v11  ;;  %v175_v43 = vpack.c.bf16 %v172_v40, %v172_v40  ;;  %v902_v44 = vld [vmem:[%s1278_s1 + $0xb0] ss:$8 sps:$4 sm:$0xff]   ;;  %v906_v45 = vld [vmem:[%s1278_s1 + $0xc4] ss:$8 sps:$4 sm:$0xff]   ;;  %v908_v46 = vld [vmem:[%s1278_s1 + $0xc0] ss:$8 sps:$4 sm:$0xff]  }
  0x1d   : > { %496 = vmatprep.mubr.bf16.mxu0 %v174_v34  ;;  %v912_v47 = vld [vmem:[%s1278_s1 + $0xd4] ss:$8 sps:$4 sm:$0xff]   ;;  %v914_v48 = vld [vmem:[%s1278_s1 + $0xd0] ss:$8 sps:$4 sm:$0xff]   ;;  %v918_v49 = vld [vmem:[%s1278_s1 + $0xe4] ss:$8 sps:$4 sm:$0xff]  }
  0x1e   : > { %512 = vmatpush1.bf16.msra.mxu1 %v899_v21  ;;  %v920_v50 = vld [vmem:[%s1278_s1 + $0xe0] ss:$8 sps:$4 sm:$0xff]   ;;  %v924_v51 = vld [vmem:[%s1278_s1 + $0xf4] ss:$8 sps:$4 sm:$0xff]   ;;  %v926_v52 = vld [vmem:[%s1278_s1 + $0xf0] ss:$8 sps:$4 sm:$0xff]  }
  0x1f   : > { %473 = vmatpush1.bf16.msra.mxu0 %v869_v14  ;;  %513 = vmatprep.subr.bf16.mxu1 %v903_v23  ;;  %v170_v53 = vld [vmem:[%s1166_s9] sm:$0xff]  ;;  %s998_s9 = smov 64   ;;  %s161_s17 = sand.u32 1, %s985_s13  }
  0x20   : > { %474 = vmatprep.subr.bf16.mxu0 %v870_v15  ;;  %v173_v54 = vpack.c.bf16 %v170_v53, %v170_v53  ;;  %v546_v7 = vld [vmem:[%s1279_s2] sm:$0xff]  ;;  %s737_s19 = sshll.u32 %s161_s17, 3  ;;  %s790_s20 = sshll.u32 %s1041_s16, 7 }
  0x21   : > { %s163_s24 = scalar_lea.vmem [#allocation2], %s737_s19  ;;  %s1234_s28 = scalar_lea.hbm %s1280_s3, %s790_s20 }
  0x22   : > { %514 = vmatpush1.bf16.msra.mxu1 %v905_v25  ;;  %s674_s25 = sshll.u32 %s163_s24, 4  ;;  %s661_s16 = scalar_lea.sflag [#allocation3], %s161_s17  ;;  %s1236_s25 = int_to_ptr.vmem [resolvable:$true] %s674_s25 }
  0x23   : > { %475 = vmatpush1.bf16.msra.mxu0 %v872_v18  ;;  %515 = vmatprep.subr.bf16.mxu1 %v909_v27  ;;  %s931_s29 = scalar_lea.vmem %s1236_s25, 128  ;;  %s999_s30 = smov [#allocation2]  }
  0x24   : > { %476 = vmatprep.subr.bf16.mxu0 %v873_v20  ;;  %p932_p11 = scmp.ne.s32.totalorder %s1236_s25, %s931_s29  ;;  %s935_s4 = sshll.u32 %s999_s30, 4  ;;  %s936_s4 = int_to_ptr.vmem [resolvable:$false] %s935_s4 }
  0x25   : > { %s937_s5 = scalar_lea.vmem %s936_s4, 256  ;;  %p938_p0 = scmp.lt.s32.totalorder %s1236_s25, %s936_s4 }
  0x26   : > { %516 = vmatpush1.bf16.msra.mxu1 %v911_v29  ;;  %p933_p12 = pnand %p932_p11, %p1058_p5  ;;  %p939_p1 = scmp.lt.s32.totalorder %s937_s5, %s931_s29 }
  0x27   : > { %477 = vmatpush1.bf16.msra.mxu0 %v875_v22  ;;  %517 = vmatprep.subr.bf16.mxu1 %v915_v31 }
  0x28   : > { %478 = vmatprep.subr.bf16.mxu0 %v876_v24  ;;  %p934_p13 = pneg %p933_p12  ;;  %p940_p2 = por %p939_p1, %p938_p0 }
  0x2a   : > { %518 = vmatpush1.bf16.msra.mxu1 %v917_v35  ;;  %p941_p3 = pnand %p940_p2, %p934_p13 }
  0x2b   : > { %479 = vmatpush1.bf16.msra.mxu0 %v878_v26  ;;  %519 = vmatprep.subr.bf16.mxu1 %v921_v37 }
  0x2c   : > { %480 = vmatprep.subr.bf16.mxu0 %v882_v28 }
  0x2e   : > { %520 = vmatpush1.bf16.msra.mxu1 %v923_v39 }
  0x2f   : > { %481 = vmatpush1.bf16.msra.mxu0 %v884_v30  ;;  %797 = vmatprep.subr.bf16.mxu1 %v996_v55 }
  0x30   : > { %482 = vmatprep.subr.bf16.mxu0 %v888_v32 }
  0x31   : > { %538 = vmatmul.mubr.bf16.vlgmr.msra.gmra.mrb[0].mxu1 %v175_v43 }
  0x32   : > { %799 = vmatprep.mubr.msk.bf16.mxu1 %vm997_vm0, %v996_v55 }
  0x33   : > { %483 = vmatpush1.bf16.msra.mxu0 %v890_v36 }
  0x34   : > { %484 = vmatprep.subr.bf16.mxu0 %v894_v38 }
  0x37   : > { %485 = vmatpush1.bf16.msra.mxu0 %v896_v41 }
  0x38   : > { %486 = vmatprep.subr.bf16.mxu0 %v900_v42 }
  0x3b   : > { %487 = vmatpush1.bf16.msra.mxu0 %v902_v44 }
  0x3c   : > { %488 = vmatprep.subr.bf16.mxu0 %v906_v45 }
  0x3f   : > { %489 = vmatpush1.bf16.msra.mxu0 %v908_v46 }
  0x40   : > { %490 = vmatprep.subr.bf16.mxu0 %v912_v47 }
  0x43   : > { %491 = vmatpush1.bf16.msra.mxu0 %v914_v48 }
  0x44   : > { %492 = vmatprep.subr.bf16.mxu0 %v918_v49 }
  0x47   : > { %493 = vmatpush1.bf16.msra.mxu0 %v920_v50 }
  0x48   : > { %494 = vmatprep.subr.bf16.mxu0 %v924_v51 }
  0x4b   : > { %495 = vmatpush1.bf16.msra.mxu0 %v926_v52 }
  0x4e   : > { %497 = vmatmul.mubr.bf16.vlgmr.msra.gmra.mrb[0].mxu0 %v173_v54 }
 0x104   : > { %v539_v56 = vpop.f32.mrb[0].mxu1 }
 0x105   : > { %v541_v57 = vpop.f32.mrb[1].mxu1 }
 0x106   : > { %v543_v58 = vpop.f32.mrb[2].mxu1 }
 0x107   : > { %v544_v59 = vpop.f32.mrb[3].mxu1 }
 0x121   : > { %v498_v60 = vpop.f32.mrb[0].mxu0 }
 0x122   : > { %v540_v61 = vadd.f32 %v539_v56, %v498_v60  ;;  %v500_v62 = vpop.f32.mrb[1].mxu0 }
 0x123   : > { %v542_v63 = vadd.f32 %v541_v57, %v500_v62  ;;  %v502_v0 = vpop.f32.mrb[2].mxu0 }
 0x124   : > { %v547_v1 = vpack.c.bf16 %v540_v61, %v540_v61  ;;  %v503_v2 = vpop.f32.mrb[3].mxu0 }
 0x125   : > { %v548_v4 = vpack.c.bf16 %v542_v63, %v542_v63 }
 0x126   : > { %v557_v3 = vsel %vm552_vm1, %v547_v1, 0  ;;  %550 = vrot.lane.b32.xlu0 %v547_v1, %s998_s9 }
 0x127   : > { %798 = vmatpush3.bf16.xpose.msra.mxu1 %v557_v3  ;;  %v616_v6 = vsel %vm614_vm2, %v548_v4, 0 }
 0x128   : > { %803 = vmatprep.subr.bf16.mxu1 %v996_v55 }
 0x198   : > { %v551_v5 = vpop.permute.xlu0 %550 }
 0x199   : > { %800 = vmatmul.mubr.msk.bf16.vlgmr.msra.gmra.mrb[4].mxu1 %vm552_vm1, %v551_v5 }
 0x19a   : > { %804 = vmatpush3.bf16.msra.mxu1 %v616_v6  ;;  %805 = vmatprep.mubr.msk.bf16.mxu1 %vm997_vm0, %v996_v55 }
 0x26c   : > { %v593_v8 = vpop.f32.mrb[4].mxu1 }
 0x26d   : > { %v594_v9 = vadd.f32 %v593_v8, %v546_v7  ;;  %v801_v10 = vpop.f32.mrb[5].mxu1 }
 0x26e   : > { %v596_v11 = vpop.f32.mrb[6].mxu1 }
 0x26f   : > { %v802_v12 = vpop.f32.mrb[7].mxu1  ;;  %v600_v13 = vsel %vm599_vm3, %v594_v9, -inf }
 0x270   : > { %601 = vmax.xlane.f32.xlu0 %v600_v13 }
 0x2fd   : > { %v602_v14 = vpop.xlane.xlu0 %601 }
 0x2fe   : > { %v603_v15 = vsub.f32 %v594_v9, %v602_v14 }
 0x300   : > { %v604_v16 = vmul.f32 1.442695, %v603_v15 }
 0x302   : > { %927 = vpow2.f32 %v604_v16 }
 0x30c   : > { %v928_v17 = vpop.eup %927 }
 0x30d   : > { %v606_v18 = vsel %vm599_vm3, %v928_v17, 0.0  ;;  %v610_v19 = vpack.c.bf16 %v928_v17, %v928_v17 }
 0x30e   : > { %607 = vadd.xlane.f32.xlu1 %v606_v18 }
 0x30f   : > { %806 = vmatmul.mubr.msk.bf16.vlgmr.msra.gmra.mrb[8].mxu1 %vm599_vm3, %v610_v19 }
 0x39b   : > { %v608_v20 = vpop.xlane.xlu1 %607 }
 0x39c   : > { %929 = vrcp.f32 %v608_v20 }
 0x3a6   : > { %v930_v21 = vpop.eup %929 }
 0x3e2   : > { %v652_v22 = vpop.f32.mrb[8].mxu1 }
 0x3e3   : > { %v658_v23 = vmul.f32 %v930_v21, %v652_v22  ;;  %v807_v24 = vpop.f32.mrb[9].mxu1 }
 0x3e4   : > { %v655_v25 = vpop.f32.mrb[10].mxu1 }
 0x3e5   : > { %v808_v26 = vpop.f32.mrb[11].mxu1  ;;  %659 = vst.msk [vmem:[%s163_s24] sm:$0xff] %vm552_vm1, %v658_v23 }
 0x3e6   : > { %944 = shalt.err (!%p941_p3)
}
 0x3e7   : > { %s945_s6 = scalar_lea.hbm %s1234_s28, 128  ;;  %s949_s9 = scalar_lea.hbm %s1280_s3, 256 }
 0x3e8   : > { %p946_p4 = scmp.ne.s32.totalorder %s1234_s28, %s945_s6  ;;  %p950_p9 = scmp.lt.u32.totalorder %s1234_s28, %s1280_s3 }
 0x3e9   : > { %p951_p10 = scmp.lt.u32.totalorder %s949_s9, %s945_s6  ;;  %p953_p12 = scmp.lt.u32.totalorder %s945_s6, %s1234_s28 }
 0x3ea   : > { %p947_p7 = pnand %p946_p4, %p1058_p5 }
 0x3eb   : > { %p952_p11 = por %p951_p10, %p950_p9 }
 0x3ec   : > { %p948_p8 = pneg %p947_p7 }
 0x3ed   : > { %p954_p13 = por %p953_p12, %p952_p11 }
 0x3ef   : > { %p955_p0 = pnand %p954_p13, %p948_p8 }
 0x3f1   : > { %958 = shalt.err (!%p955_p0)
}
 0x3f2   : > { %812 = dma.vmem_to_hbm [thread:$0]  (%p1058_p5), %s1236_s25, 128, %s1234_s28, %s661_s16  }
 0x3f3 PF: > { %p818_p1 = scmp.ge.s32.totalorder %s993_s15, 2  ;;  %s686_s17 = sand.u32 1, %s981_s12  }
 0x3f4   : > { %s687_s19 = scalar_lea.sflag [#allocation3], %s686_s17 }
 0x3f5   : > { %p815_p2 = pnand %p818_p1, %p1062_p6 }
 0x3f7   : > { %976 = dma.done.wait (!%p815_p2), %s687_s19, 128  }
 0x3f8   : > { %978 = vsyncadd (!%p815_p2), %s687_s19, 4294967168  ;;  %p13_p3 = scmp.ge.s32.totalorder %s1045_s18, 4   ;;  %s1283_s12 = smov %s985_s13 }
 0x3f9   : > { %s1284_s13 = smov %s989_s14  ;;  %s1285_s14 = smov %s1056_s21 }
 0x3fa   : > { %s1286_s15 = smov %s1045_s18  ;;  %15 = sbr.rel (!%p13_p3) target bundleno = 3 (0x3), region = 67 }
 0x401   :  { %692 = vsyncpa [#allocation3], 1 }
 0x402   :  { %694 = vsyncpa [#allocation3 + $0x1], 1 }

</bundles_post_ra>
